<compile_context>
chip_gen: v7x
topology: tpu7x:2x2x1
jax: 0.10.0
libtpu: 0.0.40
codegen_flags: <defaults>
</compile_context>

<pallas_src>
import functools

import jax
import jax.numpy as jnp
from jax.experimental import pallas as pl
from jax.experimental.pallas import tpu as pltpu


# ----------------------------------------------------------------------------
# Kernels
# ----------------------------------------------------------------------------
def _pa_kernel_vpu(x_ref, w1t_ref, b1_ref, w2_ref, b2_ref, o_ref):
    """Small-C path: conv1 on the VPU (broadcast FMA over sublane rows).

    x_ref:   (C, T)   one batch's channel-by-pixel slab (storage dtype)
    w1t_ref: (C, Ch)  conv1 weight, transposed, f32 (VMEM)
    b1_ref:  (Ch,)    f32 (SMEM)
    w2_ref:  (Ch,)    f32 (SMEM)
    b2_ref:  (1,)     f32 (SMEM)
    o_ref:   (C, T)
    """
    x = x_ref[...]                                  # keep storage dtype
    xf = x.astype(jnp.float32)
    t = x.shape[1]
    ch = w1t_ref.shape[1]

    # z = b2 + sum_o w2[o] * relu(b1[o] + sum_c w1[o,c] * x[c, :])
    z = jnp.full((1, t), b2_ref[0], dtype=jnp.float32)
    for o in range(ch):                              # Ch is tiny (C // 8)
        h_o = jnp.sum(xf * w1t_ref[:, o:o + 1], axis=0, keepdims=True) + b1_ref[o]
        z = z + w2_ref[o] * jnp.maximum(h_o, 0.0)

    y = jax.nn.sigmoid(z)                            # (1, T) f32 gate
    o_ref[...] = (x * y.astype(x.dtype)).astype(o_ref.dtype)


def _pa_kernel_mxu(x_ref, w1_ref, b1_ref, w2_ref, b2_ref, o_ref):
    """Large-C path: conv1 on the MXU (bf16 operands, f32 accumulate).

    x_ref:  (C, T)   storage dtype
    w1_ref: (Ch, C)  bf16 (or x dtype if already narrow)
    b1_ref: (Ch, 1)  f32 (VMEM)
    w2_ref: (Ch, 1)  f32 (VMEM)
    b2_ref: (1,)     f32 (SMEM)
    o_ref:  (C, T)
    """
    x = x_ref[...]
    h = jnp.dot(w1_ref[...], x.astype(w1_ref.dtype),
                preferred_element_type=jnp.float32)          # (Ch, T) f32
    h = jnp.maximum(h + b1_ref[...], 0.0)

    # conv2 (C//8 -> 1) as VPU multiply + sublane reduce.
    z = jnp.sum(h * w2_ref[...], axis=0, keepdims=True) + b2_ref[0]
    y = jax.nn.sigmoid(z)
    o_ref[...] = (x * y.astype(x.dtype)).astype(o_ref.dtype)


# ----------------------------------------------------------------------------
# Tiling
# ----------------------------------------------------------------------------
def _pick_tile_hw(hw, c, itemsize, batch, *, target_bytes=2 << 20, lane=128,
                  min_split_lanes=2048):
    """Spatial tile (lanes): ~target_bytes of x per block, multiple of 128.

    The grid uses pl.cdiv, so the tile does NOT need to divide H*W (partial
    trailing tile).  When one batch fits in a single block, split it in two
    (if it stays >= min_split_lanes) so v7x's two TensorCores both get work.
    """
    max_t = max(lane, (target_bytes // max(1, c * itemsize)) // lane * lane)
    if max_t >= hw:
        # Whole spatial extent fits in a VMEM-friendly block.
        if batch == 1 and hw >= 2 * min_split_lanes:
            return pl.cdiv(pl.cdiv(hw, 2), lane) * lane   # 2 balanced steps
        return hw                                          # full-dim block (exempt from 128 rule)
    return max_t                                           # >= 2 spatial steps by construction


# ----------------------------------------------------------------------------
# Wrapper
# ----------------------------------------------------------------------------
def pa_layer(x_nchw, w1, b1, w2, b2, *, tile_hw=None, vpu_conv1_max_c=64,
             donate_x=False):
    """PALayer forward.

    x_nchw: (B, C, H, W).  w1: (C//8, C), b1: (C//8,), w2: (1, C//8), b2: (1,).
    donate_x=True aliases the input buffer to the output (only if the caller
    no longer needs x).
    """
    B, C, H, W = x_nchw.shape
    Ch = w1.shape[0]                     # C // 8
    HW = H * W

    x_flat = x_nchw.reshape(B, C, HW)    # pure view, no data movement
    itemsize = jnp.dtype(x_nchw.dtype).itemsize
    if tile_hw is None:
        tile_hw = _pick_tile_hw(HW, C, itemsize, B)
    grid = (B, pl.cdiv(HW, tile_hw))

    x_spec = pl.BlockSpec((None, C, tile_hw), lambda b, j: (b, 0, j))
    out_spec = pl.BlockSpec((None, C, tile_hw), lambda b, j: (b, 0, j))
    smem_spec = pl.BlockSpec(memory_space=pltpu.MemorySpace.SMEM)

    if C <= vpu_conv1_max_c:
        # VPU conv1: the skinny K=C matmul would under-utilize the MXU and can
        # become the binding unit; broadcast-FMAs over sublanes are cheaper.
        kernel = _pa_kernel_vpu
        w1_arg = jnp.asarray(w1, jnp.float32).T            # (C, Ch)
        b1_arg = jnp.asarray(b1, jnp.float32).reshape(Ch)   # SMEM
        w2_arg = jnp.asarray(w2, jnp.float32).reshape(Ch)   # SMEM
        b2_arg = jnp.asarray(b2, jnp.float32).reshape(1)    # SMEM
        in_specs = [
            x_spec,
            pl.BlockSpec((C, Ch), lambda b, j: (0, 0)),
            smem_spec, smem_spec, smem_spec,
        ]
    else:
        # MXU conv1: bf16 operands (gate path is precision-insensitive),
        # f32 accumulation on the MXU.
        kernel = _pa_kernel_mxu
        mxu_dtype = jnp.bfloat16 if x_nchw.dtype == jnp.float32 else x_nchw.dtype
        w1_arg = jnp.asarray(w1, mxu_dtype)                  # (Ch, C)
        b1_arg = jnp.asarray(b1, jnp.float32).reshape(Ch, 1)
        w2_arg = jnp.asarray(w2, jnp.float32).reshape(Ch, 1)
        b2_arg = jnp.asarray(b2, jnp.float32).reshape(1)     # SMEM
        in_specs = [
            x_spec,
            pl.BlockSpec((Ch, C), lambda b, j: (0, 0)),
            pl.BlockSpec((Ch, 1), lambda b, j: (0, 0)),
            pl.BlockSpec((Ch, 1), lambda b, j: (0, 0)),
            smem_spec,
        ]

    out_flat = pl.pallas_call(
        kernel,
        out_shape=jax.ShapeDtypeStruct((B, C, HW), x_nchw.dtype),
        grid_spec=pltpu.PrefetchScalarGridSpec(
            num_scalar_prefetch=0,
            grid=grid,
            in_specs=in_specs,
            out_specs=out_spec,
        ),
        compiler_params=pltpu.CompilerParams(
            dimension_semantics=("parallel", "parallel"),
            # Explicit cap: ~2 MiB blocks -> ~10 MiB resident; well inside
            # 48 MiB on every generation (v7x physical VMEM is 64 MiB/TC).
            vmem_limit_bytes=48 << 20,
        ),
        input_output_aliases=({0: 0} if donate_x else {}),
    )(x_flat, w1_arg, b1_arg, w2_arg, b2_arg)

    return out_flat.reshape(B, C, H, W)


# ----------------------------------------------------------------------------
# Pure-JAX reference (matches the PyTorch module, stays NCHW)
# ----------------------------------------------------------------------------
def _reference(x_nchw, w1, b1, w2, b2):
    x = x_nchw.astype(jnp.float32)
    h = jnp.einsum("oc,bchw->bohw", w1.astype(jnp.float32), x)
    h = jnp.maximum(h + b1[None, :, None, None], 0.0)
    y = jnp.einsum("oc,bchw->bohw", w2.astype(jnp.float32), h)
    y = jax.nn.sigmoid(y + b2[None, :, None, None])
    return (x * y).astype(x_nchw.dtype)


if __name__ == "__main__":
    key = jax.random.PRNGKey(0)

    def run_case(B, C, H, W, tile_hw, tol):
        Ch = max(1, C // 8)
        case_key = jax.random.fold_in(key, C * 10000 + H * 100 + W)
        kx, k1, kb1, k2, kb2 = jax.random.split(case_key, 5)
        x = jax.random.normal(kx, (B, C, H, W), dtype=jnp.float32)
        w1 = jax.random.normal(k1, (Ch, C), dtype=jnp.float32) * 0.2
        b1 = jax.random.normal(kb1, (Ch,), dtype=jnp.float32) * 0.1
        w2 = jax.random.normal(k2, (1, Ch), dtype=jnp.float32) * 0.2
        b2 = jax.random.normal(kb2, (1,), dtype=jnp.float32) * 0.1

        out = pa_layer(x, w1, b1, w2, b2, tile_hw=tile_hw)
        jax.block_until_ready(out)
        ref = _reference(x, w1, b1, w2, b2)
        assert out.shape == (B, C, H, W)
        assert jnp.allclose(out, ref, atol=tol, rtol=tol), \
            f"mismatch vs reference (C={C}, H={H}, W={W})"

    # 1) Small-C (VPU conv1 path), auto tile, even spatial tiling.
    run_case(B=2, C=16, H=16, W=16, tile_hw=None, tol=1e-5)
    # 2) Small-C with a partial trailing spatial tile (cdiv grid path).
    run_case(B=2, C=16, H=16, W=12, tile_hw=128, tol=1e-5)
    # 3) Large-C (MXU conv1 path: bf16 operands, f32 accumulate on the gate).
    run_case(B=2, C=128, H=16, W=16, tile_hw=None, tol=5e-2)

    print("KERNEL_OK")
</pallas_src>

<mosaic_0001>
module attributes {stable_mosaic.version = 11 : i64} {
  func.func @_pa_kernel_vpu(%arg0: i32, %arg1: i32, %arg2: memref<1x16x256xf32, #tpu.memory_space<vmem>>, %arg3: memref<16x2xf32, #tpu.memory_space<vmem>>, %arg4: memref<2xf32, #tpu.memory_space<smem>>, %arg5: memref<2xf32, #tpu.memory_space<smem>>, %arg6: memref<1xf32, #tpu.memory_space<smem>>, %arg7: memref<1x16x256xf32, #tpu.memory_space<vmem>>) attributes {dimension_semantics = [#tpu.dimension_semantics<parallel>, #tpu.dimension_semantics<parallel>], iteration_bounds = array<i64: 2, 1>, scalar_prefetch = 0 : i64, scratch_operands = 0 : i64, tpu.core_type = #tpu.core_type<tc>, window_params = [{transform_indices = @transform_0, window_bounds = array<i64: 1, 16, 256>}, {pipeline_mode = #tpu.pipeline_mode<synchronous>, transform_indices = @transform_1, window_bounds = array<i64: 16, 2>}, {transform_indices = @transform_2, window_bounds = array<i64: 2>}, {transform_indices = @transform_3, window_bounds = array<i64: 2>}, {transform_indices = @transform_4, window_bounds = array<i64: 1>}, {transform_indices = @transform_5, window_bounds = array<i64: 1, 16, 256>}]} {
    %c0 = arith.constant 0 : index
    %c0_0 = arith.constant 0 : index
    %c0_1 = arith.constant 0 : index
    %0 = vector.load %arg2[%c0, %c0_0, %c0_1] : memref<1x16x256xf32, #tpu.memory_space<vmem>>, vector<1x16x256xf32>
    %1 = vector.shape_cast %0 : vector<1x16x256xf32> to vector<16x256xf32>
    %c0_2 = arith.constant 0 : index
    %2 = memref.load %arg6[%c0_2] : memref<1xf32, #tpu.memory_space<smem>>
    %3 = vector.broadcast %2 : f32 to vector<1x256xf32>
    %c0_3 = arith.constant 0 : index
    %c0_4 = arith.constant 0 : index
    %4 = vector.load %arg3[%c0_3, %c0_4] : memref<16x2xf32, #tpu.memory_space<vmem>>, vector<16x1xf32>
    %5 = vector.broadcast %4 : vector<16x1xf32> to vector<16x256xf32>
    %6 = arith.mulf %1, %5 : vector<16x256xf32>
    %cst = arith.constant dense<0.000000e+00> : vector<256xf32>
    %7 = vector.multi_reduction <add>, %6, %cst [0] : vector<16x256xf32> to vector<256xf32>
    %8 = vector.shape_cast %7 : vector<256xf32> to vector<1x256xf32>
    %c0_5 = arith.constant 0 : index
    %9 = memref.load %arg4[%c0_5] : memref<2xf32, #tpu.memory_space<smem>>
    %10 = vector.broadcast %9 : f32 to vector<1x256xf32>
    %11 = arith.addf %8, %10 : vector<1x256xf32>
    %c0_6 = arith.constant 0 : index
    %12 = memref.load %arg5[%c0_6] : memref<2xf32, #tpu.memory_space<smem>>
    %cst_7 = arith.constant 0.000000e+00 : f32
    %13 = vector.broadcast %cst_7 : f32 to vector<1x256xf32>
    %14 = arith.maximumf %11, %13 : vector<1x256xf32>
    %15 = vector.broadcast %12 : f32 to vector<1x256xf32>
    %16 = arith.mulf %15, %14 : vector<1x256xf32>
    %17 = arith.addf %3, %16 : vector<1x256xf32>
    %c0_8 = arith.constant 0 : index
    %c1 = arith.constant 1 : index
    %18 = vector.load %arg3[%c0_8, %c1] : memref<16x2xf32, #tpu.memory_space<vmem>>, vector<16x1xf32>
    %19 = vector.broadcast %18 : vector<16x1xf32> to vector<16x256xf32>
    %20 = arith.mulf %1, %19 : vector<16x256xf32>
    %cst_9 = arith.constant dense<0.000000e+00> : vector<256xf32>
    %21 = vector.multi_reduction <add>, %20, %cst_9 [0] : vector<16x256xf32> to vector<256xf32>
    %22 = vector.shape_cast %21 : vector<256xf32> to vector<1x256xf32>
    %c1_10 = arith.constant 1 : index
    %23 = memref.load %arg4[%c1_10] : memref<2xf32, #tpu.memory_space<smem>>
    %24 = vector.broadcast %23 : f32 to vector<1x256xf32>
    %25 = arith.addf %22, %24 : vector<1x256xf32>
    %c1_11 = arith.constant 1 : index
    %26 = memref.load %arg5[%c1_11] : memref<2xf32, #tpu.memory_space<smem>>
    %cst_12 = arith.constant 0.000000e+00 : f32
    %27 = vector.broadcast %cst_12 : f32 to vector<1x256xf32>
    %28 = arith.maximumf %25, %27 : vector<1x256xf32>
    %29 = vector.broadcast %26 : f32 to vector<1x256xf32>
    %30 = arith.mulf %29, %28 : vector<1x256xf32>
    %31 = arith.addf %17, %30 : vector<1x256xf32>
    %32 = arith.negf %31 : vector<1x256xf32>
    %33 = math.exp %32 : vector<1x256xf32>
    %cst_13 = arith.constant 1.000000e+00 : f32
    %34 = vector.broadcast %cst_13 : f32 to vector<1x256xf32>
    %35 = arith.addf %34, %33 : vector<1x256xf32>
    %36 = arith.divf %34, %35 : vector<1x256xf32>
    %37 = vector.broadcast %36 : vector<1x256xf32> to vector<16x256xf32>
    %38 = arith.mulf %1, %37 : vector<16x256xf32>
    %c0_14 = arith.constant 0 : index
    %c0_15 = arith.constant 0 : index
    %c0_16 = arith.constant 0 : index
    %39 = vector.load %arg7[%c0_14, %c0_15, %c0_16] : memref<1x16x256xf32, #tpu.memory_space<vmem>>, vector<1x16x256xf32>
    %40 = vector.shape_cast %39 : vector<1x16x256xf32> to vector<16x256xf32>
    %41 = vector.shape_cast %38 : vector<16x256xf32> to vector<1x16x256xf32>
    tpu.vector_store %arg7[%c0_14, %c0_15, %c0_16], %41 {strides = array<i32>} : memref<1x16x256xf32, #tpu.memory_space<vmem>>, vector<1x16x256xf32>,
    return
  }
  func.func @transform_0(%arg0: i32, %arg1: i32) -> (i32, i32, i32) {
    %c0_i32 = arith.constant 0 : i32
    %c0_i32_0 = arith.constant 0 : i32
    return %arg0, %c0_i32, %arg1 : i32, i32, i32
  }
  func.func @transform_1(%arg0: i32, %arg1: i32) -> (i32, i32) {
    %c0_i32 = arith.constant 0 : i32
    %c0_i32_0 = arith.constant 0 : i32
    %c0_i32_1 = arith.constant 0 : i32
    return %c0_i32, %c0_i32_0 : i32, i32
  }
  func.func @transform_2(%arg0: i32, %arg1: i32) -> i32 {
    %c0_i32 = arith.constant 0 : i32
    %c0_i32_0 = arith.constant 0 : i32
    return %c0_i32 : i32
  }
  func.func @transform_3(%arg0: i32, %arg1: i32) -> i32 {
    %c0_i32 = arith.constant 0 : i32
    %c0_i32_0 = arith.constant 0 : i32
    return %c0_i32 : i32
  }
  func.func @transform_4(%arg0: i32, %arg1: i32) -> i32 {
    %c0_i32 = arith.constant 0 : i32
    %c0_i32_0 = arith.constant 0 : i32
    return %c0_i32 : i32
  }
  func.func @transform_5(%arg0: i32, %arg1: i32) -> (i32, i32, i32) {
    %c0_i32 = arith.constant 0 : i32
    %c0_i32_0 = arith.constant 0 : i32
    return %arg0, %c0_i32, %arg1 : i32, i32, i32
  }
}

</mosaic_0001>

<bundles_post_ra>
// kernel: tpu_custom_call.1
= control target key start
LH: loop header
LB: loop body
LE: loop exit
PB: predicated region body
PF: predicated region fallthrough
CT: control target
= control target key end

     0   :  { %s1087_s0 = inlined_call_operand.hbm [shape: f32[2,16,256], index: 0, kind: input, shape index: {}]   ;;  %s1088_s1 = inlined_call_operand.vmem [shape: f32[16,2], index: 1, kind: input, shape index: {}]   ;;  %s1089_s2 = inlined_call_operand.vmem [shape: f32[2], index: 2, kind: input, shape index: {}]   ;;  %s1090_s3 = inlined_call_operand.vmem [shape: f32[2], index: 3, kind: input, shape index: {}]   ;;  %s1091_s4 = inlined_call_operand.<no memory space> [shape: f32[1], index: 4, kind: input, shape index: {}]   ;;  %s1092_s5 = inlined_call_operand.hbm [shape: f32[2,16,256], index: 5, kind: output, shape index: {}]  }
   0x1   :  { %10 = sst [smem:[#allocation2]] %s1091_s4 }
   0x2   :  { %11 = vsyncpa [#allocation4], 0 }
   0x3   :  { %13 = vsyncpa [#allocation4 + $0x1], 0 }
   0x4   :  { %14 = vsyncpa [#allocation6], 0 }
   0x5   :  { %15 = vsyncpa [#allocation9], 0 }
   0x6   :  { %16 = vsyncpa [#allocation5], 0 }
   0x7   :  { %18 = vsyncpa [#allocation5 + $0x1], 0  ;;  %s842_s20 = smov 0   ;;  %s844_s21 = smov 0  }
   0x8   :  { %s846_s22 = smov 0   ;;  %s848_s23 = smov 0  }
   0x9   :  { %s850_s24 = smov 0   ;;  %s852_s25 = smov 0  }
   0xa LB: > { %s522_s4 = sadd.s32 4294967295, %s797_s25   ;;  %s523_s26 = sadd.s32 4294967294, %s797_s25   ;;  %s797_s25 = sphi %s852_s25, %s24_s25   ;;  %s793_s24 = sphi %s850_s24, %s1118_s24   ;;  %s789_s23 = sphi %s848_s23, %s1117_s23   ;;  %s785_s22 = sphi %s846_s22, %s1116_s22   ;;  %s781_s21 = sphi %s844_s21, %s1115_s21   ;;  %s777_s20 = sphi %s842_s20, %s1114_s20  }
   0xb   : > { %s45_s27 = sadd.s32 1, %s785_s22  ;;  %p52_p0 = scmp.ne.s32.totalorder %s785_s22, %s781_s21 }
   0xc   : > { %p53_p1 = scmp.eq.s32.totalorder %s797_s25, 0  ;;  %p58_p2 = scmp.ne.s32.totalorder %s781_s21, %s777_s20 }
   0xd   : > { %p880_p3 = scmp.eq.s32.totalorder %s522_s4, 0  ;;  %p168_p4 = scmp.eq.s32.totalorder %s522_s4, 1 }
   0xe   : > { %p884_p5 = por %p53_p1, %p52_p0  ;;  %p174_p6 = scmp.eq.s32.totalorder %s523_s26, 1 }
   0xf   : > { %s1099_s28 = scalar_select %p880_p3, 1, 0 }
  0x10   : > { %p890_p7 = por %p880_p3, %p58_p2  ;;  %p894_p8 = por %p168_p4, %p52_p0 }
  0x11   : > { %p898_p9 = por %p174_p6, %p58_p2  ;;  %p524_p10 = scmp.ge.s32.totalorder %s797_s25, 1 }
  0x12   : > { %s1101_s30 = scalar_select %p890_p7, 1, 0 }
  0x13   : > { %s1102_s6 = scalar_select %p894_p8, 1, 0 }
  0x14   : > { %s1103_s7 = scalar_select %p898_p9, 1, 0 }
  0x15   : > { %p181_p11 = scmp.lt.s32.totalorder %s797_s25, 3  ;;  %s197_s10 = sshll.u32 %s1089_s2, 4  ;;  %s198_s10 = int_to_ptr.vmem [resolvable:$true] %s197_s10 }
  0x16   : > { %p576_p0 = scmp.lt.s32.totalorder %s797_s25, 2  ;;  %s208_s14 = sshll.u32 %s1090_s3, 4  ;;  %s209_s14 = int_to_ptr.vmem [resolvable:$true] %s208_s14 }
  0x17   : > { %p907_p12 = pnand %p524_p10, %p181_p11  ;;  %s647_s17 = scalar_lea.vmem %s198_s10, 16 }
  0x18   : > { %p920_p2 = pnand %p576_p0, %p884_p5  ;;  %p648_p6 = scmp.ne.s32.totalorder %s198_s10, %s647_s17 }
  0x19   : > { %s1104_s11 = scalar_select %p907_p12, 1, 0 }
  0x1a   : > { %p559_p1 = pneg %p907_p12  ;;  %p655_p9 = scmp.lt.s32.totalorder %s198_s10, %s198_s10 }
  0x1b   : > { %s1105_s15 = scalar_select %p920_p2, 1, 0 }
  0x1c   : > { %p926_p4 = pnand %p559_p1, %p880_p3  ;;  %p656_p8 = scmp.lt.s32.totalorder %s647_s17, %s647_s17 }
  0x1e   : > { %p649_p10 = pneg %p926_p4  ;;  %p657_p7 = por %p656_p8, %p655_p9 }
  0x20   : > { %p650_p11 = pnand %p649_p10, %p648_p6 }
  0x22   : > { %p651_p13 = pneg %p650_p11 }
  0x24   : > { %p658_p5 = pnand %p657_p7, %p651_p13 }
  0x26   : > { %661 = shalt.err (!%p658_p5)
}
  0x27   : > { %s799_s18 = smov [#allocation7]   ;;  %s662_s19 = scalar_lea.vmem %s209_s14, 16 }
  0x28   : > { %562 = dma.vmem_to_smem (!%p926_p4), %s198_s10, 16, %s799_s18, [#allocation6]  }
  0x29   : > { %p663_p0 = scmp.ne.s32.totalorder %s209_s14, %s662_s19  ;;  %p670_p12 = scmp.lt.s32.totalorder %s209_s14, %s209_s14 }
  0x2a   : > { %p671_p2 = scmp.lt.s32.totalorder %s662_s19, %s662_s19 }
  0x2b   : > { %p665_p1 = pnand %p663_p0, %p649_p10 }
  0x2c   : > { %p672_p6 = por %p671_p2, %p670_p12 }
  0x2d   : > { %p666_p3 = pneg %p665_p1 }
  0x2f   : > { %p673_p11 = pnand %p672_p6, %p666_p3 }
  0x31   : > { %676 = shalt.err (!%p673_p11)
}
  0x32   : > { %s800_s4 = smov [#allocation8]   ;;  %s36_s26 = sadd.s32 1, %s793_s24 }
  0x33   : > { %565 = dma.vmem_to_smem (!%p926_p4), %s209_s14, 16, %s800_s4, [#allocation9]  }
  0x34   : > { %s222_s29 = sand.u32 1, %s785_s22   ;;  %p38_p7 = scmp.ge.s32.totalorder %s36_s26, 2 }
  0x35   : > { %s528_s8 = sshll.u32 %s222_s29, 5  ;;  %s545_s9 = sshll.u32 %s793_s24, 9 }
  0x36   : > { %s1120_s26 = smov (%p38_p7, %s36_s26), 0  ;;  %s944_s13 = scalar_lea.hbm %s1087_s0, %s545_s9 }
  0x37   : > { %s40_s16 = ssub.s32 %s793_s24, %s1120_s26  ;;  %s226_s14 = scalar_lea.vmem [#allocation3], %s528_s8 }
  0x38   : > { %s235_s17 = sshll.u32 %s226_s14, 4  ;;  %p43_p3 = scmp.eq.s32.totalorder %s40_s16, 0  ;;  %s948_s17 = int_to_ptr.vmem [resolvable:$true] %s235_s17 }
  0x39   : > { %s955_s19 = scalar_lea.sflag [#allocation4], %s222_s29  ;;  %s677_s4 = scalar_lea.hbm %s944_s13, 512 }
  0x3a   : > { %s953_s18 = scalar_select %p43_p3, %s785_s22, %s45_s27  }
  0x3b   : > { %p678_p8 = scmp.ne.s32.totalorder %s944_s13, %s677_s4  ;;  %p1107_p9 = scmp.ne.s32.totalorder %s1105_s15, 0 }
  0x3c   : > { %s682_s8 = scalar_lea.hbm %s1087_s0, 1024  ;;  %p683_p4 = scmp.lt.u32.totalorder %s944_s13, %s1087_s0 }
  0x3d   : > { %p679_p12 = pneg %p1107_p9  ;;  %p684_p10 = scmp.lt.u32.totalorder %s682_s8, %s677_s4 }
  0x3e   : > { %p686_p0 = scmp.lt.u32.totalorder %s677_s4, %s944_s13 }
  0x3f   : > { %p680_p13 = pnand %p679_p12, %p678_p8  ;;  %p685_p5 = por %p684_p10, %p683_p4 }
  0x41   : > { %p681_p2 = pneg %p680_p13  ;;  %p687_p1 = por %p686_p0, %p685_p5 }
  0x43   : > { %p688_p6 = pnand %p687_p1, %p681_p2 }
  0x45   : > { %691 = shalt.err (!%p688_p6)
}
  0x46   : > { %s692_s27 = scalar_lea.vmem %s948_s17, 512  ;;  %s801_s29 = smov [#allocation3]  }
  0x47   : > { %p693_p11 = scmp.ne.s32.totalorder %s948_s17, %s692_s27  ;;  %s697_s14 = sshll.u32 %s801_s29, 4  ;;  %s698_s14 = int_to_ptr.vmem [resolvable:$false] %s697_s14 }
  0x48   : > { %s699_s9 = scalar_lea.vmem %s698_s14, 1024  ;;  %p700_p8 = scmp.lt.s32.totalorder %s948_s17, %s698_s14 }
  0x49   : > { %p695_p7 = pnand %p693_p11, %p679_p12  ;;  %p701_p13 = scmp.lt.s32.totalorder %s699_s9, %s692_s27 }
  0x4b   : > { %p696_p3 = pneg %p695_p7  ;;  %p702_p4 = por %p701_p13, %p700_p8 }
  0x4d   : > { %p703_p10 = pnand %p702_p4, %p696_p3 }
  0x4f   : > { %706 = shalt.err (!%p703_p10)
}
  0x50   : > { %s802_s4 = smov 256   ;;  %s803_s10 = smov 16  }
  0x51   : > { %569 = dma.hbm_to_vmem [thread:$0]  (!%p1107_p9), %s944_s13, 512, %s948_s17, %s955_s19, %s802_s4, %s802_s4, %s803_s10  }
  0x52   : > { %p1108_p12 = scmp.ne.s32.totalorder %s1104_s11, 0 }
  0x53   : > { %s986_s8 = sand.u32 (!%p1108_p12), 1, %s781_s21   ;;  %p1109_p2 = scmp.ne.s32.totalorder (!%p1108_p12), %s1101_s30, 0 }
  0x54   : > { %247 = sbr.rel (%p1108_p12) target bundleno = 303 (0x12f), region = 40  ;;  %s532_s12 = sshll.u32 (!%p1108_p12), %s986_s8, 5 }
  0x55   : > { %s250_s16 = scalar_lea.sflag (!%p1108_p12), [#allocation4], %s986_s8  ;;  %s253_s27 = scalar_lea.vmem (!%p1108_p12), [#allocation3], %s532_s12 }
  0x5b   : > { %760 = dma.done.wait (%p1109_p2), %s250_s16, 512  }
  0x5c   : > { %762 = vsyncadd (%p1109_p2), %s250_s16, 4294966784  ;;  %p1110_p9 = scmp.ne.s32.totalorder %s1099_s28, 0 }
  0x5e   : > { %764 = dma.done.wait (%p1110_p9), [#allocation6], 16  }
  0x5f   : > { %766 = vsyncadd (%p1110_p9), [#allocation6], 4294967280 }
  0x60   : > { %768 = dma.done.wait (%p1110_p9), [#allocation9], 16  }
  0x61   : > { %770 = vsyncadd (%p1110_p9), [#allocation9], 4294967280 }
  0x62   : > { %266 = sfence }
  0x63   : > { %v297_v0 = vld [vmem:[%s1088_s1] sm:$0xff]  ;;  %v804_v1 = vmov 1   ;;  %v805_v2 = vmov 0   ;;  %v298_v3 = vld [vmem:[%s1088_s1 + $0x8] sm:$0xff]  ;;  %v1014_v8 = vld [vmem:[%s253_s27 + $0x10] sm:$0xff]  ;;  %s536_s28 = sld [smem:[#allocation7 + $0x1]] }
  0x64   : > { %637 = vset.pattern.permute.xlu1 %v804_v1  ;;  %636 = vset.pattern.permute.xlu0 %v805_v2  ;;  %v1010_v6 = vld [vmem:[%s253_s27] sm:$0xff]  ;;  %v1012_v7 = vld [vmem:[%s253_s27 + $0x8] sm:$0xff]  ;;  %v1016_v9 = vld [vmem:[%s253_s27 + $0x18] sm:$0xff]  ;;  %s327_s17 = sld [smem:[#allocation7]]  ;;  %s537_s29 = sld [smem:[#allocation8 + $0x1]] }
  0x65   : > { %340 = vperm.xlu1 %637, %v297_v0   ;;  %301 = vperm.xlu0 %636, %v297_v0   ;;  %s331_s19 = sld [smem:[#allocation8]]  ;;  %s546_s9 = sshll.u32 %s789_s23, 9 }
  0x66   : > { %s295_s14 = sld [smem:[#allocation2]]  ;;  %s288_s4 = scalar_lea.vmem [#allocation10], %s532_s12 }
  0x67   : > { %s413_s10 = sshll.u32 %s288_s4, 4  ;;  %s1034_s11 = scalar_lea.hbm %s1092_s5, %s546_s9  ;;  %s1036_s10 = int_to_ptr.vmem [resolvable:$true] %s413_s10 }
  0x68   : > { %s398_s23 = scalar_lea.sflag [#allocation5], %s986_s8  ;;  %s707_s12 = scalar_lea.vmem %s1036_s10, 512 }
  0x69   : > { %344 = vperm.xlu1 %637, %v298_v3   ;;  %306 = vperm.xlu0 %636, %v298_v3   ;;  %v366_v44 = vstv %s536_s28  ;;  %p708_p5 = scmp.ne.s32.totalorder %s1036_s10, %s707_s12  ;;  %p1111_p0 = scmp.ne.s32.totalorder %s1102_s6, 0 }
  0x6a   : > { %v328_v45 = vstv %s327_s17  ;;  %v372_v59 = vstv %s537_s29  ;;  %s806_s15 = smov [#allocation10]  }
  0x6b   : > { %v334_v54 = vstv %s331_s19  ;;  %p709_p1 = pnand %p708_p5, %p1111_p0  ;;  %s711_s30 = sshll.u32 %s806_s15, 4  ;;  %s712_s30 = int_to_ptr.vmem [resolvable:$false] %s711_s30 }
  0x6c   : > { %v296_v60 = vstv %s295_s14  ;;  %s713_s13 = scalar_lea.vmem %s712_s30, 1024  ;;  %p714_p11 = scmp.lt.s32.totalorder %s1036_s10, %s712_s30 }
  0x6d   : > { %638 = vset.pattern.permute.xlu0 %v804_v1  ;;  %p710_p6 = pneg %p709_p1  ;;  %p715_p7 = scmp.lt.s32.totalorder %s713_s13, %s707_s12 }
  0x6f   : > { %p716_p3 = por %p715_p7, %p714_p11 }
  0x71   : > { %p717_p8 = pnand %p716_p3, %p710_p6 }
  0xe4   : > { %v341_v4 = vpop.permute.xlu1 %340  ;;  %v302_v5 = vpop.permute.xlu0 %301 }
  0xe5   : > { %v347_v10 = vmul.f32 %v341_v4, %v1010_v6  ;;  %v348_v11 = vmul.f32 %v341_v4, %v1012_v7  ;;  %v309_v12 = vmul.f32 %v302_v5, %v1010_v6  ;;  %v310_v13 = vmul.f32 %v302_v5, %v1012_v7 }
  0xe8   : > { %v345_v14 = vpop.permute.xlu1 %344  ;;  %v307_v15 = vpop.permute.xlu0 %306 }
  0xe9   : > { %v349_v16 = vmul.f32 %v345_v14, %v1014_v8  ;;  %v350_v17 = vmul.f32 %v345_v14, %v1016_v9  ;;  %v311_v18 = vmul.f32 %v307_v15, %v1014_v8  ;;  %v312_v19 = vmul.f32 %v307_v15, %v1016_v9 }
  0xeb   : > { %v351_v20 = vadd.f32 %v349_v16, %v347_v10  ;;  %v358_v21 = vadd.f32 %v350_v17, %v348_v11  ;;  %v313_v22 = vadd.f32 %v311_v18, %v309_v12  ;;  %v320_v23 = vadd.f32 %v312_v19, %v310_v13 }
  0xed   : > { %v352_v24 = vrot.slane %v351_v20, 4  ;;  %v359_v25 = vrot.slane %v358_v21, 4  ;;  %v314_v26 = vrot.slane %v313_v22, 4  ;;  %v321_v27 = vrot.slane %v320_v23, 4 }
  0xef   : > { %v353_v28 = vadd.f32 %v352_v24, %v351_v20  ;;  %v360_v29 = vadd.f32 %v359_v25, %v358_v21  ;;  %v315_v30 = vadd.f32 %v314_v26, %v313_v22  ;;  %v322_v31 = vadd.f32 %v321_v27, %v320_v23 }
  0xf1   : > { %v354_v32 = vrot.slane %v353_v28, 2  ;;  %v361_v33 = vrot.slane %v360_v29, 2  ;;  %v316_v34 = vrot.slane %v315_v30, 2  ;;  %v323_v35 = vrot.slane %v322_v31, 2 }
  0xf3   : > { %v355_v36 = vadd.f32 %v354_v32, %v353_v28  ;;  %v362_v37 = vadd.f32 %v361_v33, %v360_v29  ;;  %v317_v38 = vadd.f32 %v316_v34, %v315_v30  ;;  %v324_v39 = vadd.f32 %v323_v35, %v322_v31 }
  0xf5   : > { %v356_v40 = vrot.slane %v355_v36, 1  ;;  %v363_v41 = vrot.slane %v362_v37, 1  ;;  %v318_v42 = vrot.slane %v317_v38, 1  ;;  %v325_v43 = vrot.slane %v324_v39, 1 }
  0xf7   : > { %v357_v46 = vadd.f32 %v356_v40, %v355_v36  ;;  %v364_v47 = vadd.f32 %v363_v41, %v362_v37  ;;  %v319_v48 = vadd.f32 %v318_v42, %v317_v38  ;;  %v326_v49 = vadd.f32 %v325_v43, %v324_v39 }
  0xf9   : > { %v367_v50 = vadd.f32 %v366_v44, %v357_v46  ;;  %v368_v51 = vadd.f32 %v366_v44, %v364_v47  ;;  %v329_v52 = vadd.f32 %v328_v45, %v319_v48  ;;  %v330_v53 = vadd.f32 %v328_v45, %v326_v49 }
  0xfb   : > { %v370_v55 = vmax.f32 %v367_v50, 0.0  ;;  %v371_v56 = vmax.f32 %v368_v51, 0.0  ;;  %v332_v57 = vmax.f32 %v329_v52, 0.0  ;;  %v333_v58 = vmax.f32 %v330_v53, 0.0 }
  0xfd   : > { %v335_v61 = vmul.f32 %v334_v54, %v332_v57  ;;  %v336_v62 = vmul.f32 %v334_v54, %v333_v58  ;;  %v373_v63 = vmul.f32 %v372_v59, %v370_v55  ;;  %v374_v0 = vmul.f32 %v372_v59, %v371_v56 }
  0xff   : > { %v337_v1 = vadd.f32 %v335_v61, %v296_v60  ;;  %v338_v2 = vadd.f32 %v336_v62, %v296_v60 }
 0x101   : > { %v375_v3 = vadd.f32 %v373_v63, %v337_v1  ;;  %v376_v4 = vadd.f32 %v374_v0, %v338_v2 }
 0x103   : > { %v538_v5 = vmul.f32 -1.442695, %v375_v3  ;;  %v539_v10 = vmul.f32 -1.442695, %v376_v4 }
 0x105   : > { %639 = vpow2.f32 %v538_v5 }
 0x106   : > { %641 = vpow2.f32 %v539_v10 }
 0x10f   : > { %v640_v11 = vpop.eup %639 }
 0x110   : > { %v642_v12 = vpop.eup %641  ;;  %v383_v13 = vadd.f32 1.0, %v640_v11 }
 0x111   : > { %v384_v14 = vadd.f32 1.0, %v642_v12 }
 0x112   : > { %643 = vrcp.f32 %v383_v13 }
 0x113   : > { %645 = vrcp.f32 %v384_v14 }
 0x11c   : > { %v644_v15 = vpop.eup %643 }
 0x11d   : > { %v646_v16 = vpop.eup %645  ;;  %v389_v17 = vmul.f32 %v644_v15, %v1010_v6  ;;  %v391_v18 = vmul.f32 %v644_v15, %v1014_v8 }
 0x11e   : > { %v390_v19 = vmul.f32 %v646_v16, %v1012_v7  ;;  %v392_v20 = vmul.f32 %v646_v16, %v1016_v9 }
 0x11f   : > { %393 = vst [vmem:[%s288_s4] sm:$0xff] %v389_v17  ;;  %395 = vst [vmem:[%s288_s4 + $0x10] sm:$0xff] %v391_v18 }
 0x120   : > { %394 = vst [vmem:[%s288_s4 + $0x8] sm:$0xff] %v390_v19  ;;  %396 = vst [vmem:[%s288_s4 + $0x18] sm:$0xff] %v392_v20 }
 0x121   : > { %720 = shalt.err (!%p717_p8)
}
 0x122   : > { %s721_s28 = scalar_lea.hbm %s1034_s11, 512  ;;  %s725_s29 = scalar_lea.hbm %s1092_s5, 1024 }
 0x123   : > { %p722_p13 = scmp.ne.s32.totalorder %s1034_s11, %s721_s28  ;;  %p726_p12 = scmp.lt.u32.totalorder %s1034_s11, %s1092_s5 }
 0x124   : > { %p727_p2 = scmp.lt.u32.totalorder %s725_s29, %s721_s28  ;;  %p729_p5 = scmp.lt.u32.totalorder %s721_s28, %s1034_s11 }
 0x125   : > { %p723_p4 = pnand %p722_p13, %p1111_p0 }
 0x126   : > { %p728_p9 = por %p727_p2, %p726_p12 }
 0x127   : > { %p724_p10 = pneg %p723_p4 }
 0x128   : > { %p730_p1 = por %p729_p5, %p728_p9 }
 0x12a   : > { %p731_p6 = pnand %p730_p1, %p724_p10 }
 0x12c   : > { %734 = shalt.err (!%p731_p6)
}
 0x12d   : > { %s807_s4 = smov 256   ;;  %s808_s16 = smov 16  }
 0x12e   : > { %557 = dma.vmem_to_hbm [thread:$0]  (%p1111_p0), %s1036_s10, 512, %s1034_s11, %s398_s23, %s807_s4, %s807_s4, %s808_s16  }
 0x12f PF: > { %s428_s27 = sand.u32 1, %s777_s20   ;;  %p1112_p11 = scmp.ne.s32.totalorder %s1103_s7, 0 }
 0x130   : > { %p1113_p7 = scmp.ge.s32.totalorder %s797_s25, 2  ;;  %s429_s12 = scalar_lea.sflag [#allocation5], %s428_s27 }
 0x132   : > { %p571_p3 = pnand %p1113_p7, %p1112_p11 }
 0x134   : > { %772 = dma.done.wait (!%p571_p3), %s429_s12, 512  }
 0x135   : > { %774 = vsyncadd (!%p571_p3), %s429_s12, 4294966784  ;;  %s24_s25 = sadd.s32 1, %s797_s25   ;;  %s1114_s20 = smov %s781_s21 }
 0x136   : > { %p21_p8 = scmp.ge.s32.totalorder %s24_s25, 4   ;;  %s1115_s21 = smov %s785_s22 }
 0x137   : > { %s1116_s22 = smov %s953_s18  ;;  %s1117_s23 = smov %s793_s24 }
 0x138   : > { %s1118_s24 = smov %s1120_s26  ;;  %23 = sbr.rel (!%p21_p8) target bundleno = 10 (0xa), region = 94 }
 0x13f   :  { %434 = vsyncpa [#allocation4], 1 }
 0x140   :  { %436 = vsyncpa [#allocation4 + $0x1], 1 }
 0x141   :  { %437 = vsyncpa [#allocation5], 1 }
 0x142   :  { %439 = vsyncpa [#allocation5 + $0x1], 1 }
 0x143   :  { %440 = vsyncpa [#allocation6], 1 }
 0x144   :  { %442 = vsyncpa [#allocation6 + $0x1], 1 }
 0x145   :  { %443 = vsyncpa [#allocation9], 1 }

</bundles_post_ra>
